<compile_context>
chip_gen: v6e
topology: v6e:2x2x1
jax: 0.10.0
libtpu: 0.0.40
codegen_flags: <defaults>
</compile_context>

<pallas_src>
import functools
import math

import jax
import jax.numpy as jnp
from jax.experimental import pallas as pl
from jax.experimental.pallas import tpu as pltpu

_MASK = -1e30  # large finite negative; avoids -inf - -inf NaNs in the online max


def _round_up(a, b):
    return (a + b - 1) // b * b


# ---------------------------------------------------------------------------
# Prologue: per-sample partial activations + matched-pair scores (row-tiled).
# ---------------------------------------------------------------------------
def _prologue_kernel(x_ref, y_ref, w1x_ref, w1y_ref, b1_ref, w2row_ref,
                     hxbT_out, hy_out, t0_out):
    hx = jnp.dot(x_ref[...], w1x_ref[...], preferred_element_type=jnp.float32)  # [T, H]
    hy = jnp.dot(y_ref[...], w1y_ref[...], preferred_element_type=jnp.float32)  # [T, H]
    hxb = hx + b1_ref[...]                       # bias b1 folded exactly once
    hxbT_out[...] = hxb.T                        # [H, T]: sublane-sliceable later
    hy_out[...] = hy                             # [T, H]
    # Matched pairs: t0_i = w2 . relu(hxb_i + hy_i)   (b2 added in the wrapper).
    h0 = jnp.maximum(hxb + hy, 0.0)
    t0_out[...] = jnp.sum(h0 * w2row_ref[...], axis=1, keepdims=True)  # [T, 1]


# ---------------------------------------------------------------------------
# Pair kernel: [TM, TN] tile of the NxN pair matrix + online logsumexp over j.
# ---------------------------------------------------------------------------
def _pair_kernel(hy_ref, hxbT_ref, w2_ref, corr_ref, m_scr, l_scr,
                 *, n_valid, log_n):
    j = pl.program_id(1)
    nj = pl.num_programs(1)
    tm, hidden = hy_ref.shape
    tn = hxbT_ref.shape[1]

    @pl.when(j == 0)
    def _():
        m_scr[...] = jnp.full_like(m_scr, _MASK)
        l_scr[...] = jnp.zeros_like(l_scr)

    hy = hy_ref[...]        # [TM, H]   rows  <- y_i
    hxbT = hxbT_ref[...]    # [H, TN]   cols  <- x_j  (bias already folded)

    # t1[i, j] = sum_h w2[h] * relu(hy[i, h] + hxb[j, h])
    # Accumulated directly as a [TM, TN] tile on the VPU — no [TM, TN, H]
    # intermediate, no degenerate (., H) @ (H, 1) MXU matmul.
    acc = jnp.zeros((tm, tn), jnp.float32)
    for h in range(hidden):                          # static unroll (H is small)
        pre = hy[:, h:h + 1] + hxbT[h:h + 1, :]      # [TM, TN] broadcast add
        acc = acc + w2_ref[h] * jnp.maximum(pre, 0.0)

    # Mask padded columns (global column index >= n_valid) before max / exp.
    col = j * tn + jax.lax.broadcasted_iota(jnp.int32, (tm, tn), 1)
    t1 = jnp.where(col < n_valid, acc, _MASK)

    # Online logsumexp update (running max / running sum).
    m_prev = m_scr[...]                                            # [TM, 1]
    m_new = jnp.maximum(m_prev, jnp.max(t1, axis=1, keepdims=True))
    p = jnp.exp(t1 - m_new)              # masked entries underflow to exactly 0
    alpha = jnp.exp(m_prev - m_new)
    l_scr[...] = alpha * l_scr[...] + jnp.sum(p, axis=1, keepdims=True)
    m_scr[...] = m_new

    @pl.when(j == nj - 1)
    def _():
        # corr_i = exp(logsumexp_j acc_ij - log n); the exp(b2 - 1) factor and
        # the final mean are applied in the wrapper.
        corr_ref[...] = jnp.exp(m_scr[...] - log_n) * l_scr[...]


# ---------------------------------------------------------------------------
# Wrapper
# ---------------------------------------------------------------------------
def nwj_forward(x, y, w1, b1, w2, b2, *, block_rows=None, block_cols=None):
    """x: [N, x_dim], y: [N, y_dim]; w1: [x_dim+y_dim, H]; b1: [H]; w2: [H, 1]; b2: [1]."""
    n, x_dim = x.shape
    _, y_dim = y.shape
    hidden = w1.shape[1]

    # Tile selection: <=512 keeps double-buffered [T, H] input blocks plus the
    # [T, T] f32 tile accumulator far below scoped-VMEM defaults.  Row / column
    # tiles must be multiples of 128 or equal the padded full extent (hxbT is
    # emitted with N on the lane axis).
    if block_rows is None and block_cols is None:
        tile = min(512, _round_up(n, 8))
        block_rows = block_cols = tile
    elif block_rows is None or block_cols is None:
        raise ValueError("Specify both block_rows and block_cols or neither.")
    n_pad = _round_up(n, math.lcm(block_rows, block_cols))
    assert n_pad % block_rows == 0 and n_pad % block_cols == 0
    assert block_rows % 128 == 0 or block_rows == n_pad
    assert block_cols % 128 == 0 or block_cols == n_pad

    def pad_rows(a):
        if a.shape[0] == n_pad:
            return a
        return jnp.pad(a, ((0, n_pad - a.shape[0]), (0, 0)))

    x_p = pad_rows(x.astype(jnp.float32))
    y_p = pad_rows(y.astype(jnp.float32))
    w1x = w1[:x_dim, :].astype(jnp.float32)
    w1y = w1[x_dim:, :].astype(jnp.float32)
    b1row = b1.reshape(1, hidden).astype(jnp.float32)
    w2row = w2.reshape(1, hidden).astype(jnp.float32)
    w2flat = w2.reshape(hidden).astype(jnp.float32)

    vmem_cap = 32 * 1024 * 1024

    # ---- prologue: hxb^T, hy, t0 rows (gridded over row tiles) ----
    n_row_tiles = n_pad // block_rows
    hxbT, hy, t0rows = pl.pallas_call(
        _prologue_kernel,
        out_shape=(jax.ShapeDtypeStruct((hidden, n_pad), jnp.float32),
                   jax.ShapeDtypeStruct((n_pad, hidden), jnp.float32),
                   jax.ShapeDtypeStruct((n_pad, 1), jnp.float32)),
        grid=(n_row_tiles,),
        in_specs=[pl.BlockSpec((block_rows, x_dim), lambda i: (i, 0)),
                  pl.BlockSpec((block_rows, y_dim), lambda i: (i, 0)),
                  pl.BlockSpec((x_dim, hidden), lambda i: (0, 0)),
                  pl.BlockSpec((y_dim, hidden), lambda i: (0, 0)),
                  pl.BlockSpec((1, hidden), lambda i: (0, 0)),
                  pl.BlockSpec((1, hidden), lambda i: (0, 0))],
        out_specs=(pl.BlockSpec((hidden, block_rows), lambda i: (0, i)),
                   pl.BlockSpec((block_rows, hidden), lambda i: (i, 0)),
                   pl.BlockSpec((block_rows, 1), lambda i: (i, 0))),
        compiler_params=pltpu.CompilerParams(
            dimension_semantics=("parallel",),
            vmem_limit_bytes=vmem_cap),
    )(x_p, y_p, w1x, w1y, b1row, w2row)

    # ---- gridded pair kernel: online logsumexp over the NxN pair matrix ----
    grid = (n_pad // block_rows, n_pad // block_cols)
    corr_rows = pl.pallas_call(
        functools.partial(_pair_kernel, n_valid=n, log_n=math.log(n)),
        out_shape=jax.ShapeDtypeStruct((n_pad, 1), jnp.float32),
        grid=grid,
        in_specs=[pl.BlockSpec((block_rows, hidden), lambda i, j: (i, 0)),
                  pl.BlockSpec((hidden, block_cols), lambda i, j: (0, j)),
                  pl.BlockSpec(memory_space=pltpu.MemorySpace.SMEM)],
        out_specs=pl.BlockSpec((block_rows, 1), lambda i, j: (i, 0)),
        scratch_shapes=[pltpu.VMEM((block_rows, 1), jnp.float32),   # running max
                        pltpu.VMEM((block_rows, 1), jnp.float32)],  # running sum
        compiler_params=pltpu.CompilerParams(
            dimension_semantics=("parallel", "arbitrary"),
            vmem_limit_bytes=vmem_cap),
    )(hy, hxbT, w2flat)

    # Tiny final combine (O(N) work).
    b2s = b2.reshape(()).astype(jnp.float32)
    t0_mean = jnp.sum(t0rows[:n, 0]) / n + b2s
    corr_mean = jnp.exp(b2s - 1.0) * (jnp.sum(corr_rows[:n, 0]) / n)
    return t0_mean - corr_mean


def nwj_reference(x, y, w1, b1, w2, b2):
    """Pure-JAX mirror of the PyTorch forward for validation."""
    n = y.shape[0]

    def f(inp):  # inp [..., x_dim+y_dim]
        h = jnp.maximum(inp @ w1 + b1, 0.0)
        return h @ w2 + b2  # [..., 1]

    x_tile = jnp.broadcast_to(x[None, :, :], (n,) + x.shape)      # [N, N, Dx]
    y_tile = jnp.broadcast_to(y[:, None, :], (n, n, y.shape[1]))  # [N, N, Dy]
    t0 = f(jnp.concatenate([x, y], axis=-1))                      # [N, 1]
    t1 = f(jnp.concatenate([x_tile, y_tile], axis=-1)) - 1.0      # [N, N, 1]
    lse = jax.scipy.special.logsumexp(t1, axis=1)                 # [N, 1]
    return jnp.mean(t0) - jnp.mean(jnp.exp(lse - math.log(n)))


def _make_params(key, n, x_dim, y_dim, hidden):
    kx, ky, kw1, kb1, kw2, kb2 = jax.random.split(key, 6)
    x = jax.random.normal(kx, (n, x_dim), dtype=jnp.float32)
    y = jax.random.normal(ky, (n, y_dim), dtype=jnp.float32)
    fan1 = x_dim + y_dim
    w1 = jax.random.uniform(kw1, (fan1, hidden), jnp.float32,
                            -1.0 / math.sqrt(fan1), 1.0 / math.sqrt(fan1))
    b1 = jax.random.uniform(kb1, (hidden,), jnp.float32,
                            -1.0 / math.sqrt(fan1), 1.0 / math.sqrt(fan1))
    w2 = jax.random.uniform(kw2, (hidden, 1), jnp.float32,
                            -1.0 / math.sqrt(hidden), 1.0 / math.sqrt(hidden))
    b2 = jax.random.uniform(kb2, (1,), jnp.float32,
                            -1.0 / math.sqrt(hidden), 1.0 / math.sqrt(hidden))
    return x, y, w1, b1, w2, b2


if __name__ == "__main__":
    key = jax.random.PRNGKey(0)
    k_small, k_big = jax.random.split(key)

    # Small case (single tile, no padding): N=8, x_dim=y_dim=4, hidden=32.
    args = _make_params(k_small, 8, 4, 4, 32)
    out = jax.block_until_ready(nwj_forward(*args))
    ref = jax.block_until_ready(nwj_reference(*args))
    assert jnp.allclose(out, ref, atol=2e-5, rtol=2e-5), (out, ref)

    # Larger case exercising the 2-D grid, column masking (N=300 padded to 384)
    # and the online logsumexp accumulation across j tiles.
    args2 = _make_params(k_big, 300, 3, 5, 16)
    out2 = jax.block_until_ready(
        nwj_forward(*args2, block_rows=128, block_cols=128))
    ref2 = jax.block_until_ready(nwj_reference(*args2))
    assert jnp.allclose(out2, ref2, atol=1e-4, rtol=1e-4), (out2, ref2)

    print("KERNEL_OK")
</pallas_src>

<mosaic_0001>
module attributes {stable_mosaic.version = 11 : i64} {
  func.func @_prologue_kernel(%arg0: i32, %arg1: memref<8x4xf32, #tpu.memory_space<vmem>>, %arg2: memref<8x4xf32, #tpu.memory_space<vmem>>, %arg3: memref<4x32xf32, #tpu.memory_space<vmem>>, %arg4: memref<4x32xf32, #tpu.memory_space<vmem>>, %arg5: memref<1x32xf32, #tpu.memory_space<vmem>>, %arg6: memref<1x32xf32, #tpu.memory_space<vmem>>, %arg7: memref<32x8xf32, #tpu.memory_space<vmem>>, %arg8: memref<8x32xf32, #tpu.memory_space<vmem>>, %arg9: memref<8x1xf32, #tpu.memory_space<vmem>>) attributes {dimension_semantics = [#tpu.dimension_semantics<parallel>], iteration_bounds = array<i64: 1>, scalar_prefetch = 0 : i64, scratch_operands = 0 : i64, tpu.core_type = #tpu.core_type<tc>, window_params = [{transform_indices = @transform_0, window_bounds = array<i64: 8, 4>}, {transform_indices = @transform_1, window_bounds = array<i64: 8, 4>}, {pipeline_mode = #tpu.pipeline_mode<synchronous>, transform_indices = @transform_2, window_bounds = array<i64: 4, 32>}, {pipeline_mode = #tpu.pipeline_mode<synchronous>, transform_indices = @transform_3, window_bounds = array<i64: 4, 32>}, {pipeline_mode = #tpu.pipeline_mode<synchronous>, transform_indices = @transform_4, window_bounds = array<i64: 1, 32>}, {pipeline_mode = #tpu.pipeline_mode<synchronous>, transform_indices = @transform_5, window_bounds = array<i64: 1, 32>}, {transform_indices = @transform_6, window_bounds = array<i64: 32, 8>}, {transform_indices = @transform_7, window_bounds = array<i64: 8, 32>}, {transform_indices = @transform_8, window_bounds = array<i64: 8, 1>}]} {
    %c0 = arith.constant 0 : index
    %c0_0 = arith.constant 0 : index
    %0 = vector.load %arg1[%c0, %c0_0] : memref<8x4xf32, #tpu.memory_space<vmem>>, vector<8x4xf32>
    %c0_1 = arith.constant 0 : index
    %c0_2 = arith.constant 0 : index
    %1 = vector.load %arg3[%c0_1, %c0_2] : memref<4x32xf32, #tpu.memory_space<vmem>>, vector<4x32xf32>
    %cst = arith.constant dense<0.000000e+00> : vector<8x32xf32>
    %2 = tpu.matmul %0, %1, %cst {dimension_numbers = #tpu.dot_dimension_numbers<[1], [0], [0], [1], [0, 0, 1, 1], [], []>} : vector<8x4xf32>, vector<4x32xf32>, vector<8x32xf32> -> vector<8x32xf32>
    %c0_3 = arith.constant 0 : index
    %c0_4 = arith.constant 0 : index
    %3 = vector.load %arg2[%c0_3, %c0_4] : memref<8x4xf32, #tpu.memory_space<vmem>>, vector<8x4xf32>
    %c0_5 = arith.constant 0 : index
    %c0_6 = arith.constant 0 : index
    %4 = vector.load %arg4[%c0_5, %c0_6] : memref<4x32xf32, #tpu.memory_space<vmem>>, vector<4x32xf32>
    %cst_7 = arith.constant dense<0.000000e+00> : vector<8x32xf32>
    %5 = tpu.matmul %3, %4, %cst_7 {dimension_numbers = #tpu.dot_dimension_numbers<[1], [0], [0], [1], [0, 0, 1, 1], [], []>} : vector<8x4xf32>, vector<4x32xf32>, vector<8x32xf32> -> vector<8x32xf32>
    %c0_8 = arith.constant 0 : index
    %c0_9 = arith.constant 0 : index
    %6 = vector.load %arg5[%c0_8, %c0_9] : memref<1x32xf32, #tpu.memory_space<vmem>>, vector<1x32xf32>
    %7 = vector.broadcast %6 : vector<1x32xf32> to vector<8x32xf32>
    %8 = arith.addf %2, %7 : vector<8x32xf32>
    %9 = tpu.transpose %8, [1, 0] : vector<8x32xf32> -> vector<32x8xf32>
    %c0_10 = arith.constant 0 : index
    %c0_11 = arith.constant 0 : index
    %10 = vector.load %arg7[%c0_10, %c0_11] : memref<32x8xf32, #tpu.memory_space<vmem>>, vector<32x8xf32>
    tpu.vector_store %arg7[%c0_10, %c0_11], %9 {strides = array<i32>} : memref<32x8xf32, #tpu.memory_space<vmem>>, vector<32x8xf32>,
    %c0_12 = arith.constant 0 : index
    %c0_13 = arith.constant 0 : index
    %11 = vector.load %arg8[%c0_12, %c0_13] : memref<8x32xf32, #tpu.memory_space<vmem>>, vector<8x32xf32>
    tpu.vector_store %arg8[%c0_12, %c0_13], %5 {strides = array<i32>} : memref<8x32xf32, #tpu.memory_space<vmem>>, vector<8x32xf32>,
    %12 = arith.addf %8, %5 : vector<8x32xf32>
    %cst_14 = arith.constant 0.000000e+00 : f32
    %13 = vector.broadcast %cst_14 : f32 to vector<8x32xf32>
    %14 = arith.maximumf %12, %13 : vector<8x32xf32>
    %c0_15 = arith.constant 0 : index
    %c0_16 = arith.constant 0 : index
    %15 = vector.load %arg6[%c0_15, %c0_16] : memref<1x32xf32, #tpu.memory_space<vmem>>, vector<1x32xf32>
    %16 = vector.broadcast %15 : vector<1x32xf32> to vector<8x32xf32>
    %17 = arith.mulf %14, %16 : vector<8x32xf32>
    %cst_17 = arith.constant dense<0.000000e+00> : vector<8xf32>
    %18 = vector.multi_reduction <add>, %17, %cst_17 [1] : vector<8x32xf32> to vector<8xf32>
    %19 = vector.shape_cast %18 : vector<8xf32> to vector<8x1xf32>
    %c0_18 = arith.constant 0 : index
    %c0_19 = arith.constant 0 : index
    %20 = vector.load %arg9[%c0_18, %c0_19] : memref<8x1xf32, #tpu.memory_space<vmem>>, vector<8x1xf32>
    tpu.vector_store %arg9[%c0_18, %c0_19], %19 {strides = array<i32>} : memref<8x1xf32, #tpu.memory_space<vmem>>, vector<8x1xf32>,
    return
  }
  func.func @transform_0(%arg0: i32) -> (i32, i32) {
    %c0_i32 = arith.constant 0 : i32
    %c0_i32_0 = arith.constant 0 : i32
    return %arg0, %c0_i32 : i32, i32
  }
  func.func @transform_1(%arg0: i32) -> (i32, i32) {
    %c0_i32 = arith.constant 0 : i32
    %c0_i32_0 = arith.constant 0 : i32
    return %arg0, %c0_i32 : i32, i32
  }
  func.func @transform_2(%arg0: i32) -> (i32, i32) {
    %c0_i32 = arith.constant 0 : i32
    %c0_i32_0 = arith.constant 0 : i32
    %c0_i32_1 = arith.constant 0 : i32
    return %c0_i32, %c0_i32_0 : i32, i32
  }
  func.func @transform_3(%arg0: i32) -> (i32, i32) {
    %c0_i32 = arith.constant 0 : i32
    %c0_i32_0 = arith.constant 0 : i32
    %c0_i32_1 = arith.constant 0 : i32
    return %c0_i32, %c0_i32_0 : i32, i32
  }
  func.func @transform_4(%arg0: i32) -> (i32, i32) {
    %c0_i32 = arith.constant 0 : i32
    %c0_i32_0 = arith.constant 0 : i32
    %c0_i32_1 = arith.constant 0 : i32
    return %c0_i32, %c0_i32_0 : i32, i32
  }
  func.func @transform_5(%arg0: i32) -> (i32, i32) {
    %c0_i32 = arith.constant 0 : i32
    %c0_i32_0 = arith.constant 0 : i32
    %c0_i32_1 = arith.constant 0 : i32
    return %c0_i32, %c0_i32_0 : i32, i32
  }
  func.func @transform_6(%arg0: i32) -> (i32, i32) {
    %c0_i32 = arith.constant 0 : i32
    %c0_i32_0 = arith.constant 0 : i32
    return %c0_i32, %arg0 : i32, i32
  }
  func.func @transform_7(%arg0: i32) -> (i32, i32) {
    %c0_i32 = arith.constant 0 : i32
    %c0_i32_0 = arith.constant 0 : i32
    return %arg0, %c0_i32 : i32, i32
  }
  func.func @transform_8(%arg0: i32) -> (i32, i32) {
    %c0_i32 = arith.constant 0 : i32
    %c0_i32_0 = arith.constant 0 : i32
    return %arg0, %c0_i32 : i32, i32
  }
}

</mosaic_0001>

<bundles_post_ra>
// kernel: tpu_custom_call.1
= control target key start
LH: loop header
LB: loop body
LE: loop exit
PB: predicated region body
PF: predicated region fallthrough
CT: control target
= control target key end

     0   :  { %vm35_vm0 = vcmask 1043456   ;;  %v313_v2 = vmov 0.0   ;;  %vm31_vm1 = vcmask 31744   ;;  %s397_s0 = inlined_call_operand.vmem [shape: f32[8,4], index: 0, kind: input, shape index: {}]   ;;  %s398_s1 = inlined_call_operand.vmem [shape: f32[8,4], index: 1, kind: input, shape index: {}]   ;;  %s399_s2 = inlined_call_operand.vmem [shape: f32[4,32], index: 2, kind: input, shape index: {}]   ;;  %s400_s3 = inlined_call_operand.vmem [shape: f32[4,32], index: 3, kind: input, shape index: {}]   ;;  %s401_s4 = inlined_call_operand.vmem [shape: f32[1,32], index: 4, kind: input, shape index: {}]   ;;  %s402_s5 = inlined_call_operand.vmem [shape: f32[1,32], index: 5, kind: input, shape index: {}]   ;;  %s403_s6 = inlined_call_operand.vmem [shape: f32[32,8], index: 6, kind: output, shape index: {0}]   ;;  %s404_s7 = inlined_call_operand.hbm [shape: f32[8,32], index: 7, kind: output, shape index: {1}]   ;;  %s405_s8 = inlined_call_operand.vmem [shape: f32[8,1], index: 8, kind: output, shape index: {2}]  }
   0x1   :  { %v30_v0 = vld [vmem:[%s400_s3] sm:$0xf]  ;;  %278 = vmatprep.subr.mxu0 %v313_v2  ;;  %283 = vmatprep.subr.mxu1 %v313_v2 }
   0x2   :  { %v29_v1 = vld [vmem:[%s398_s1] sm:$0xff] }
   0x3   :  { %v28_v3 = vld [vmem:[%s399_s2] sm:$0xf] }
   0x4   :  { %v27_v4 = vld [vmem:[%s397_s0] sm:$0xff] }
   0x5   :  { %14 = vsyncpa [#allocation3], 0  ;;  %279 = vmatpush3.msk.msra.mxu0 %vm35_vm0, %v30_v0  ;;  %vm314_vm2 = vmmov 0   ;;  %284 = vmatpush3.msk.msra.mxu1 %vm35_vm0, %v28_v3  ;;  %v270_v5 = vld [vmem:[%s401_s4] ss:$0 sm:$0xff]  ;;  %vm229_vm3 = vcmask 261120  }
   0x6   :  { %280 = vmatprep.mubr.msk.f32.mxu0 %vm314_vm2, %v313_v2  ;;  %285 = vmatprep.mubr.msk.f32.mxu1 %vm314_vm2, %v313_v2  ;;  %v273_v12 = vld [vmem:[%s402_s5] ss:$0 sm:$0xff]  ;;  %s315_s13 = smov [#allocation2]  }
   0x7   :  { %281 = vmatmul.mubr.msk.f32.vlgmr.msra.gmra.mxu0 %vm31_vm1, %v29_v1  ;;  %286 = vmatmul.mubr.msk.f32.vlgmr.msra.gmra.mxu1 %vm31_vm1, %v27_v4  ;;  %s254_s14 = sshll.u32 %s315_s13, 4  ;;  %s255_s14 = int_to_ptr.vmem [resolvable:$true] %s254_s14 }
   0x8   :  { %s291_s4 = scalar_lea.vmem %s255_s14, 128  ;;  %p296_p1 = scmp.lt.s32.totalorder %s255_s14, %s255_s14 }
   0x9   :  { %p292_p0 = scmp.ne.s32.totalorder %s255_s14, %s291_s4  ;;  %p297_p2 = scmp.lt.s32.totalorder %s291_s4, %s291_s4 }
   0xb   :  { %p298_p3 = por %p297_p2, %p296_p1 }
   0xd   :  { %p299_p4 = pnand %p298_p3, %p292_p0 }
  0xc7   :  { %v105_v6 = vpop.f32.mrf.mxu0  ;;  %v188_v7 = vpop.f32.mrf.mxu1 }
  0xc8   :  { %v189_v8 = vadd.f32 %v270_v5, %v188_v7  ;;  %230 = vst.msk [vmem:[#allocation2] sm:$0xff] %vm229_vm3, %v105_v6 }
  0xc9   :  { %v282_v9 = vpop.f32.mrf.mxu0  ;;  %v287_v10 = vpop.f32.mrf.mxu1 }
  0xca   :  { %v231_v11 = vadd.f32 %v189_v8, %v105_v6 }
  0xcc   :  { %v232_v13 = vmax.f32 %v231_v11, 0.0 }
  0xce   :  { %v240_v14 = vmul.f32 %v273_v12, %v232_v13 }
  0xd0   :  { %v241_v15 = vsel %vm229_vm3, %v240_v14, 0.0 }
  0xd1   :  { %242 = vadd.xlane.f32.xlu0 %v241_v15 }
  0xfe   :  { %192 = vxpose.xlu0.b32.start.end [1/1] (short) (narrow) %v189_v8, 32 }
  0xff   :  { %302 = shalt.err (!%p299_p4)
}
 0x100   :  { %257 = dma.vmem_to_hbm [thread:$0]  %s255_s14, 128, %s404_s7, [#allocation3]   ;;  %vm244_vm4 = vcmask 7168   ;;  %vm224_vm5 = vcmask 64512  }
 0x15a   :  { %v243_v16 = vpop.xlane.xlu0 %242 }
 0x15b   :  { %245 = vst.msk [vmem:[%s405_s8] sm:$0xff] %vm244_vm4, %v243_v16 }
 0x17a   :  { %v208_v17 = vpop.trf.xlu0 }
 0x17b   :  { %225 = vst.msk [vmem:[%s403_s6] sm:$0xff] %vm224_vm5, %v208_v17 }
 0x17e   :  { %v209_v18 = vpop.trf.xlu0 }
 0x17f   :  { %226 = vst.msk [vmem:[%s403_s6 + $0x8] sm:$0xff] %vm224_vm5, %v209_v18 }
 0x182   :  { %v210_v19 = vpop.trf.xlu0 }
 0x183   :  { %227 = vst.msk [vmem:[%s403_s6 + $0x10] sm:$0xff] %vm224_vm5, %v210_v19 }
 0x186   :  { %v211_v20 = vpop.trf.xlu0 }
 0x187   :  { %228 = vst.msk [vmem:[%s403_s6 + $0x18] sm:$0xff] %vm224_vm5, %v211_v20 }
 0x188   :  { %311 = dma.done.wait [#allocation3], 128  }
 0x189   :  { %312 = vsyncadd [#allocation3], 4294967168 }
 0x18a   :  { %267 = vsyncpa [#allocation3], 1 }

</bundles_post_ra>
